<compile_context>
chip_gen: v7x
topology: tpu7x:2x2x1
jax: 0.10.0
libtpu: 0.0.40
codegen_flags: <defaults>
</compile_context>

<pallas_src>
import functools

import jax
import jax.numpy as jnp
from jax import lax
from jax.experimental import pallas as pl
from jax.experimental.pallas import tpu as pltpu


def _readout_kernel(x_ref, w_ref, o_ref, acc_ref, *, inv_s):
    # x_ref : (TB, TS, H)  tile of node features (VMEM)
    # w_ref : (H, H)       nn.Linear weight (out, in), untransposed
    # o_ref : (TB, H)      pooled + projected output tile
    # acc_ref: (TB, H) f32 scratch accumulating sum over the seq axis
    si = pl.program_id(1)

    @pl.when(si == 0)
    def _():
        acc_ref[...] = jnp.zeros_like(acc_ref)

    # pool-before-matmul: accumulate the seq-axis sum in f32 (VPU/XLU work only)
    acc_ref[...] += jnp.sum(x_ref[...].astype(jnp.float32), axis=1)

    @pl.when(si == pl.num_programs(1) - 1)
    def _():
        pooled = acc_ref[...] * inv_s                      # (TB, H) f32, mean over seq
        # y = pooled @ W.T expressed as a contraction of pooled dim 1 with w dim 1
        # (avoids materializing W.T outside the kernel).
        y = lax.dot_general(
            pooled,
            w_ref[...],
            dimension_numbers=(((1,), (1,)), ((), ())),
            preferred_element_type=jnp.float32,
        )                                                  # (TB, H)
        o_ref[...] = y.astype(o_ref.dtype)


def _pick_tile(dim, target):
    """Largest divisor of `dim` that is <= target (falls back to dim itself)."""
    if dim <= target:
        return dim
    for t in range(target, 0, -1):
        if dim % t == 0:
            return t
    return dim


def readout(x, w):
    """x: (B, S, H), w: (H, H) nn.Linear weight (out, in). Returns (B, H)."""
    b, s, h = x.shape

    # Batch tile: sublane-aligned (>=8) when possible; full batch if small.
    tb = b if b <= 8 else _pick_tile(b, 256)
    # Seq tile: bound the x block so VMEM does not scale with S.
    ts = _pick_tile(s, 512)

    kernel = functools.partial(_readout_kernel, inv_s=1.0 / s)

    return pl.pallas_call(
        kernel,
        out_shape=jax.ShapeDtypeStruct((b, h), x.dtype),
        grid_spec=pltpu.PrefetchScalarGridSpec(
            num_scalar_prefetch=0,
            grid=(b // tb, s // ts),                       # reduction axis last
            in_specs=[
                pl.BlockSpec((tb, ts, h), lambda bi, si: (bi, si, 0)),
                pl.BlockSpec((h, h), lambda bi, si: (0, 0)),
            ],
            out_specs=pl.BlockSpec((tb, h), lambda bi, si: (bi, 0)),
            scratch_shapes=[pltpu.VMEM((tb, h), jnp.float32)],
        ),
        compiler_params=pltpu.CompilerParams(
            dimension_semantics=("parallel", "arbitrary"),
        ),
    )(x, w)


def readout_ref(x, w):
    # pure-JAX reference: nn.Linear(bias=False) then mean over axis 1
    y = jnp.einsum("bsh,oh->bso", x, w)
    return jnp.mean(y, axis=1)


if __name__ == "__main__":
    key = jax.random.PRNGKey(0)
    kx, kw = jax.random.split(key)

    batch, seq, n_hidden = 2, 8, 32
    x = jax.random.normal(kx, (batch, seq, n_hidden), dtype=jnp.float32)
    # deterministic init for nn.Linear(n_hidden, n_hidden, bias=False) weight
    bound = 1.0 / (n_hidden ** 0.5)
    w = jax.random.uniform(
        kw, (n_hidden, n_hidden), dtype=jnp.float32, minval=-bound, maxval=bound
    )

    out = readout(x, w)
    jax.block_until_ready(out)

    ref = readout_ref(x, w)
    assert out.shape == (batch, n_hidden)
    assert jnp.allclose(out, ref, atol=1e-5, rtol=1e-5)

    print("KERNEL_OK")
</pallas_src>

<mosaic_0001>
module attributes {stable_mosaic.version = 11 : i64} {
  func.func @_readout_kernel(%arg0: i32, %arg1: i32, %arg2: memref<2x8x32xf32, #tpu.memory_space<vmem>>, %arg3: memref<32x32xf32, #tpu.memory_space<vmem>>, %arg4: memref<2x32xf32, #tpu.memory_space<vmem>>, %arg5: memref<2x32xf32, #tpu.memory_space<vmem>>) attributes {dimension_semantics = [#tpu.dimension_semantics<parallel>, #tpu.dimension_semantics<arbitrary>], iteration_bounds = array<i64: 1, 1>, scalar_prefetch = 0 : i64, scratch_operands = 1 : i64, tpu.core_type = #tpu.core_type<tc>, window_params = [{transform_indices = @transform_0, window_bounds = array<i64: 2, 8, 32>}, {pipeline_mode = #tpu.pipeline_mode<synchronous>, transform_indices = @transform_1, window_bounds = array<i64: 32, 32>}, {transform_indices = @transform_2, window_bounds = array<i64: 2, 32>}]} {
    %c0_i32 = arith.constant 0 : i32
    %0 = arith.cmpi eq, %arg1, %c0_i32 : i32
    %1 = arith.extui %0 : i1 to i32
    %c0_i32_0 = arith.constant 0 : i32
    %2 = arith.cmpi ne, %1, %c0_i32_0 : i32
    scf.if %2 {
      %cst_9 = arith.constant 0.000000e+00 : f32
      %11 = vector.broadcast %cst_9 : f32 to vector<2x32xf32>
      %c0_10 = arith.constant 0 : index
      %c0_11 = arith.constant 0 : index
      %12 = vector.load %arg5[%c0_10, %c0_11] : memref<2x32xf32, #tpu.memory_space<vmem>>, vector<2x32xf32>
      tpu.vector_store %arg5[%c0_10, %c0_11], %11 {strides = array<i32>} : memref<2x32xf32, #tpu.memory_space<vmem>>, vector<2x32xf32>,
    } else {
    }
    %c0 = arith.constant 0 : index
    %c0_1 = arith.constant 0 : index
    %3 = vector.load %arg5[%c0, %c0_1] : memref<2x32xf32, #tpu.memory_space<vmem>>, vector<2x32xf32>
    %c0_2 = arith.constant 0 : index
    %c0_3 = arith.constant 0 : index
    %c0_4 = arith.constant 0 : index
    %4 = vector.load %arg2[%c0_2, %c0_3, %c0_4] : memref<2x8x32xf32, #tpu.memory_space<vmem>>, vector<2x8x32xf32>
    %cst = arith.constant dense<0.000000e+00> : vector<2x32xf32>
    %5 = vector.multi_reduction <add>, %4, %cst [1] : vector<2x8x32xf32> to vector<2x32xf32>
    %6 = arith.addf %3, %5 : vector<2x32xf32>
    %c0_5 = arith.constant 0 : index
    %c0_6 = arith.constant 0 : index
    %7 = vector.load %arg5[%c0_5, %c0_6] : memref<2x32xf32, #tpu.memory_space<vmem>>, vector<2x32xf32>
    tpu.vector_store %arg5[%c0_5, %c0_6], %6 {strides = array<i32>} : memref<2x32xf32, #tpu.memory_space<vmem>>, vector<2x32xf32>,
    %c0_i32_7 = arith.constant 0 : i32
    %8 = arith.cmpi eq, %arg1, %c0_i32_7 : i32
    %9 = arith.extui %8 : i1 to i32
    %c0_i32_8 = arith.constant 0 : i32
    %10 = arith.cmpi ne, %9, %c0_i32_8 : i32
    scf.if %10 {
      %c0_9 = arith.constant 0 : index
      %c0_10 = arith.constant 0 : index
      %11 = vector.load %arg5[%c0_9, %c0_10] : memref<2x32xf32, #tpu.memory_space<vmem>>, vector<2x32xf32>
      %cst_11 = arith.constant 1.250000e-01 : f32
      %12 = vector.broadcast %cst_11 : f32 to vector<2x32xf32>
      %13 = arith.mulf %11, %12 : vector<2x32xf32>
      %c0_12 = arith.constant 0 : index
      %c0_13 = arith.constant 0 : index
      %14 = vector.load %arg3[%c0_12, %c0_13] : memref<32x32xf32, #tpu.memory_space<vmem>>, vector<32x32xf32>
      %cst_14 = arith.constant dense<0.000000e+00> : vector<2x32xf32>
      %15 = tpu.matmul %13, %14, %cst_14 {dimension_numbers = #tpu.dot_dimension_numbers<[1], [1], [0], [0], [0, 0, 1, 0], [], []>} : vector<2x32xf32>, vector<32x32xf32>, vector<2x32xf32> -> vector<2x32xf32>
      %c0_15 = arith.constant 0 : index
      %c0_16 = arith.constant 0 : index
      %16 = vector.load %arg4[%c0_15, %c0_16] : memref<2x32xf32, #tpu.memory_space<vmem>>, vector<2x32xf32>
      tpu.vector_store %arg4[%c0_15, %c0_16], %15 {strides = array<i32>} : memref<2x32xf32, #tpu.memory_space<vmem>>, vector<2x32xf32>,
    } else {
    }
    return
  }
  func.func @transform_0(%arg0: i32, %arg1: i32) -> (i32, i32, i32) {
    %c0_i32 = arith.constant 0 : i32
    %c0_i32_0 = arith.constant 0 : i32
    return %arg0, %arg1, %c0_i32 : i32, i32, i32
  }
  func.func @transform_1(%arg0: i32, %arg1: i32) -> (i32, i32) {
    %c0_i32 = arith.constant 0 : i32
    %c0_i32_0 = arith.constant 0 : i32
    %c0_i32_1 = arith.constant 0 : i32
    return %c0_i32, %c0_i32_0 : i32, i32
  }
  func.func @transform_2(%arg0: i32, %arg1: i32) -> (i32, i32) {
    %c0_i32 = arith.constant 0 : i32
    %c0_i32_0 = arith.constant 0 : i32
    return %arg0, %c0_i32 : i32, i32
  }
}

</mosaic_0001>

<bundles_post_ra>
// kernel: tpu_custom_call.1
= control target key start
LH: loop header
LB: loop body
LE: loop exit
PB: predicated region body
PF: predicated region fallthrough
CT: control target
= control target key end

     0   :  { %7 = vsyncpa [#allocation4], 0  ;;  %s367_s0 = inlined_call_operand.hbm [shape: f32[2,8,32], index: 0, kind: input, shape index: {}]   ;;  %s368_s1 = inlined_call_operand.hbm [shape: f32[32,32], index: 1, kind: input, shape index: {}]   ;;  %s369_s2 = inlined_call_operand.hbm [shape: f32[2,32], index: 2, kind: output, shape index: {}]  }
   0x1   :  { %8 = vsyncpa [#allocation7], 0 }
   0x2   :  { %9 = vsyncpa [#allocation5], 0  ;;  %s292_s9 = smov [#allocation3]   ;;  %s220_s13 = scalar_lea.hbm %s367_s0, 256 }
   0x3   :  { %s15_s10 = sshll.u32 %s292_s9, 4  ;;  %p221_p0 = scmp.ne.s32.totalorder %s367_s0, %s220_s13  ;;  %s16_s10 = int_to_ptr.vmem [resolvable:$true] %s15_s10 }
   0x4   :  { %p224_p1 = scmp.lt.u32.totalorder %s220_s13, %s367_s0 }
   0x6   :  { %p226_p2 = pnand %p224_p1, %p221_p0 }
   0x8   :  { %229 = shalt.err (!%p226_p2)
}
   0x9   :  { %s230_s18 = scalar_lea.vmem %s16_s10, 256  ;;  %p235_p4 = scmp.lt.s32.totalorder %s16_s10, %s16_s10 }
   0xa   :  { %p231_p3 = scmp.ne.s32.totalorder %s16_s10, %s230_s18  ;;  %p236_p5 = scmp.lt.s32.totalorder %s230_s18, %s230_s18 }
   0xc   :  { %p237_p6 = por %p236_p5, %p235_p4 }
   0xe   :  { %p238_p7 = pnand %p237_p6, %p231_p3 }
  0x10   :  { %241 = shalt.err (!%p238_p7)
}
  0x11   :  { %s293_s19 = smov 128   ;;  %s294_s20 = smov 8  }
  0x12   :  { %21 = dma.hbm_to_vmem [thread:$0]  %s367_s0, 256, %s16_s10, [#allocation4], %s293_s19, %s293_s19, %s294_s20  }
  0x13   :  { %s295_s23 = smov [#allocation6]   ;;  %s242_s27 = scalar_lea.hbm %s368_s1, 512 }
  0x14   :  { %s27_s24 = sshll.u32 %s295_s23, 4  ;;  %p243_p8 = scmp.ne.s32.totalorder %s368_s1, %s242_s27  ;;  %s28_s24 = int_to_ptr.vmem [resolvable:$true] %s27_s24 }
  0x15   :  { %p246_p9 = scmp.lt.u32.totalorder %s242_s27, %s368_s1 }
  0x17   :  { %p248_p10 = pnand %p246_p9, %p243_p8 }
  0x19   :  { %251 = shalt.err (!%p248_p10)
}
  0x1a   :  { %s252_s4 = scalar_lea.vmem %s28_s24, 512  ;;  %p257_p12 = scmp.lt.s32.totalorder %s28_s24, %s28_s24 }
  0x1b   :  { %p253_p11 = scmp.ne.s32.totalorder %s28_s24, %s252_s4  ;;  %p258_p13 = scmp.lt.s32.totalorder %s252_s4, %s252_s4 }
  0x1d   :  { %p259_p0 = por %p258_p13, %p257_p12 }
  0x1f   :  { %p260_p1 = pnand %p259_p0, %p253_p11 }
  0x21   :  { %263 = shalt.err (!%p260_p1)
}
  0x22   :  { %33 = dma.hbm_to_vmem [thread:$0]  %s368_s1, 512, %s28_s24, [#allocation7], %s293_s19, %s293_s19, %s294_s20  }
  0x23   :  { %286 = dma.done.wait [#allocation4], 256  }
  0x24   :  { %287 = vsyncadd [#allocation4], 4294967040 }
  0x25   :  { %288 = dma.done.wait [#allocation7], 512  }
  0x26   :  { %289 = vsyncadd [#allocation7], 4294966784  ;;  %vm44_vm0 = vcmask 254976   ;;  %v296_v0 = vmov 0.0|0.0   ;;  %v297_v1 = vmov 0.0   ;;  %vm298_vm1 = vmmov 0  }
  0x27   :  { %204 = vmatprep.subr.bf16.mxu0 %v296_v0  ;;  %45 = vst.msk [vmem:[#allocation2] sm:$0x3] %vm44_vm0, %v297_v1  ;;  %201 = vmatprep.mubr.msk.f32.mxu0 %vm298_vm1, %v297_v1  ;;  %vm49_vm2 = vcmask 261120   ;;  %v47_v2 = vld [vmem:[#allocation3] sm:$0xff]  ;;  %v48_v3 = vld [vmem:[#allocation3 + $0x8] sm:$0xff]  ;;  %v77_v4 = vld [vmem:[#allocation6] sm:$0xff] }
  0x28   :  { %v50_v5 = vsel %vm49_vm2, %v47_v2, 0.0  ;;  %v57_v6 = vsel %vm49_vm2, %v48_v3, 0.0  ;;  %v78_v7 = vld [vmem:[#allocation6 + $0x8] sm:$0xff]  ;;  %vm344_vm3 = vmpackc.low %vm49_vm2, %vm49_vm2  ;;  %v79_v14 = vld [vmem:[#allocation6 + $0x10] sm:$0xff]  ;;  %vm66_vm4 = vcmask 1041409   ;;  %s299_s1 = smov [#allocation8]  }
  0x29   :  { %v51_v9 = vrot.slane %v50_v5, 4  ;;  %v58_v10 = vrot.slane %v57_v6, 4  ;;  %v205_v11 = vpack.c.bf16 %v78_v7, %v77_v4  ;;  %v80_v15 = vld [vmem:[#allocation6 + $0x18] sm:$0xff]  ;;  %s173_s6 = sshll.u32 %s299_s1, 4  ;;  %s174_s6 = int_to_ptr.vmem [resolvable:$true] %s173_s6 }
  0x2a   :  { %v209_v20 = vpack.c.bf16 %v80_v15, %v79_v14  ;;  %s264_s7 = scalar_lea.vmem %s174_s6, 32  ;;  %p269_p3 = scmp.lt.s32.totalorder %s174_s6, %s174_s6 }
  0x2b   :  { %v52_v12 = vadd.f32 %v51_v9, %v50_v5  ;;  %v59_v13 = vadd.f32 %v58_v10, %v57_v6  ;;  %207 = vmatpush3.bf16.xpose.msk.msra.mxu0 %vm344_vm3, %v205_v11  ;;  %p265_p2 = scmp.ne.s32.totalorder %s174_s6, %s264_s7  ;;  %p270_p4 = scmp.lt.s32.totalorder %s264_s7, %s264_s7 }
  0x2c   :  { %208 = vmatprep.subr.bf16.mxu0 %v296_v0 }
  0x2d   :  { %v53_v16 = vrot.slane %v52_v12, 2  ;;  %v60_v17 = vrot.slane %v59_v13, 2  ;;  %p271_p5 = por %p270_p4, %p269_p3 }
  0x2e   :  { %v46_v25 = vld [vmem:[#allocation2] sm:$0x3] }
  0x2f   :  { %v54_v18 = vadd.f32 %v53_v16, %v52_v12  ;;  %v61_v19 = vadd.f32 %v60_v17, %v59_v13  ;;  %p272_p6 = pnand %p271_p5, %p265_p2 }
  0x31   :  { %v55_v21 = vrot.slane %v54_v18, 1  ;;  %v62_v22 = vrot.slane %v61_v19, 1 }
  0x33   :  { %v56_v23 = vadd.f32 %v55_v21, %v54_v18  ;;  %v63_v24 = vadd.f32 %v62_v22, %v61_v19  ;;  %211 = vmatpush3.bf16.xpose.msk.msra.mxu0 %vm344_vm3, %v209_v20 }
  0x35   :  { %v67_v26 = vsel %vm66_vm4, %v63_v24, %v56_v23 }
  0x36   :  { %v69_v27 = vadd.f32 %v67_v26, %v46_v25 }
  0x38   :  { %71 = vst.msk [vmem:[#allocation2] sm:$0x3] %vm44_vm0, %v69_v27 }
  0x3f   :  { %v75_v28 = vld [vmem:[#allocation2] sm:$0x3] }
  0x40   :  { %v76_v29 = vmul.f32 0.125, %v75_v28 }
  0x42   :  { %202 = vmatmul.mubr.msk.f32.vlgmr.msra.gmra.mrb[0].mxu0 %vm49_vm2, %v76_v29 }
 0x115   :  { %v162_v30 = vpop.f32.mrb[0].mxu0 }
 0x116   :  { %166 = vst.msk [vmem:[#allocation8] sm:$0x3] %vm44_vm0, %v162_v30  ;;  %v203_v31 = vpop.f32.mrb[1].mxu0 }
 0x117   :  { %275 = shalt.err (!%p272_p6)
}
 0x118   :  { %s276_s10 = scalar_lea.hbm %s369_s2, 32 }
 0x119   :  { %p277_p7 = scmp.ne.s32.totalorder %s369_s2, %s276_s10  ;;  %p280_p8 = scmp.lt.u32.totalorder %s276_s10, %s369_s2 }
 0x11b   :  { %p282_p9 = pnand %p280_p8, %p277_p7 }
 0x11d   :  { %285 = shalt.err (!%p282_p9)
}
 0x11e   :  { %176 = dma.vmem_to_hbm [thread:$0]  %s174_s6, 32, %s369_s2, [#allocation5]  }
 0x11f   :  { %290 = dma.done.wait [#allocation5], 32  }
 0x120   :  { %291 = vsyncadd [#allocation5], 4294967264 }
 0x121   :  { %180 = vsyncpa [#allocation4], 1 }
 0x122   :  { %181 = vsyncpa [#allocation7], 1 }
 0x123   :  { %182 = vsyncpa [#allocation5], 1 }

</bundles_post_ra>
